<compile_context>
chip_gen: v7x
topology: tpu7x:2x2x1
jax: 0.10.0
libtpu: 0.0.40
codegen_flags: <defaults>
</compile_context>

<pallas_src>
import jax
import jax.numpy as jnp
from jax.experimental import pallas as pl
from jax.experimental.pallas import tpu as pltpu

IN_FEATURES = 1024
OUT_FEATURES = 512

# Above this many rows, force >= 2 grid steps so megacore (v7x) can shard M.
_SPLIT_THRESHOLD = 256


def _round_up(x: int, m: int) -> int:
    return ((x + m - 1) // m) * m


def _linear_kernel(x_ref, w_ref, b_ref, o_ref):
    # Single MXU pass per grid step: full-K, full-N, lane-dense 512-wide store.
    x = x_ref[...].astype(w_ref.dtype)          # bf16 operands (no-op if f32)
    acc = jnp.dot(x, w_ref[...], preferred_element_type=jnp.float32)
    o_ref[...] = (acc + b_ref[...]).astype(o_ref.dtype)


def linear_projection(x, w_t, b, *, tm_max=512, out_dtype=None):
    """y = x @ w_t + b  with x:[M,K], w_t:[K,N] (bf16 or f32), b:[N]."""
    M, K = x.shape
    K2, N = w_t.shape
    assert K == K2 and b.shape == (N,)
    out_dtype = x.dtype if out_dtype is None else out_dtype

    # Tile selection (no padding — Pallas masks the partial last tile):
    #   * small M: a single (round-up) block.
    #   * larger M: at least 2 grid steps so both v7x TensorCores get work,
    #     capped at tm_max (512 keeps the double-buffered footprint ~8 MiB,
    #     safe under v5e's 16 MiB scoped-VMEM default).
    if M <= _SPLIT_THRESHOLD:
        tm = _round_up(max(M, 1), 16)
    else:
        tm = min(tm_max, _round_up(pl.cdiv(M, 2), 16))
    grid_m = pl.cdiv(M, tm)

    b2d = b.reshape(1, N).astype(jnp.float32)

    cost = pl.CostEstimate(
        flops=2 * M * K * N,
        transcendentals=0,
        bytes_accessed=(M * K * x.dtype.itemsize
                        + K * N * w_t.dtype.itemsize
                        + N * 4
                        + M * N * jnp.dtype(out_dtype).itemsize),
    )

    out = pl.pallas_call(
        _linear_kernel,
        out_shape=jax.ShapeDtypeStruct((M, N), out_dtype),
        grid_spec=pltpu.PrefetchScalarGridSpec(
            num_scalar_prefetch=0,
            grid=(grid_m,),                                 # 1-D grid over M only
            in_specs=[
                pl.BlockSpec((tm, K), lambda i: (i, 0)),    # x rows, streamed
                pl.BlockSpec((K, N), lambda i: (0, 0)),     # full weight, resident
                pl.BlockSpec((1, N), lambda i: (0, 0)),     # bias, resident
            ],
            out_specs=pl.BlockSpec((tm, N), lambda i: (i, 0)),
        ),
        compiler_params=pltpu.CompilerParams(
            dimension_semantics=("parallel",),              # megacore shards M on v7x
        ),
        cost_estimate=cost,
    )(x, w_t, b2d)

    return out


class ProjectionPallas:
    """JAX/Pallas equivalent of the PyTorch Projection module."""

    def __init__(self, key, *, weight_dtype=jnp.bfloat16):
        kw, kb = jax.random.split(key)
        # Deterministic init mimicking nn.Linear's kaiming-uniform-ish bounds.
        bound = 1.0 / (IN_FEATURES ** 0.5)
        # PyTorch stores weight as (out, in); we keep the transposed (in, out)
        # copy for the kernel (y = x @ W.T is identical math).
        w = jax.random.uniform(
            kw, (OUT_FEATURES, IN_FEATURES), jnp.float32, -bound, bound
        )
        # bf16 storage halves the dominant weight HBM read.  NOTE: results are
        # bf16-matmul precision (f32 accumulation), not bit-identical to a
        # full-f32 PyTorch nn.Linear.  Pass weight_dtype=jnp.float32 for f32.
        # TODO(synk): optional int8 (v5e/v6e) / fp8 (v7x) weight quantization.
        self.w_t = jnp.asarray(w.T).astype(weight_dtype)    # (1024, 512)
        self.b = jax.random.uniform(
            kb, (OUT_FEATURES,), jnp.float32, -bound, bound
        )

    def __call__(self, x, *, out_dtype=None):
        # Accept arbitrary leading dims, like nn.Linear (masked partial tiles
        # handle any row count — no padding copies).
        lead = x.shape[:-1]
        x2d = x.reshape(-1, IN_FEATURES)
        y = linear_projection(x2d, self.w_t, self.b, out_dtype=out_dtype)
        return y.reshape(*lead, OUT_FEATURES)


def _reference(model, x):
    """Plain-JAX reference with the same dtype handling as the kernel."""
    lead = x.shape[:-1]
    x2d = x.reshape(-1, IN_FEATURES)
    x_c = x2d.astype(model.w_t.dtype).astype(jnp.float32)
    w_c = model.w_t.astype(jnp.float32)
    y = jnp.dot(x_c, w_c, precision=jax.lax.Precision.HIGHEST) + model.b
    return y.reshape(*lead, OUT_FEATURES).astype(x.dtype)


if __name__ == "__main__":
    key = jax.random.PRNGKey(0)
    k_param, k_x1, k_x2, k_x3 = jax.random.split(key, 4)

    model = ProjectionPallas(k_param)

    # Small input consistent with the module: 2 "images" x 8 proposals, 1024 feats.
    x = jax.random.normal(k_x1, (2, 8, IN_FEATURES), jnp.float32)
    y = jax.block_until_ready(model(x))
    assert y.shape == (2, 8, OUT_FEATURES)
    assert jnp.allclose(y, _reference(model, x), atol=1e-3, rtol=1e-3)

    # Row count not a multiple of the tile / of 16 (exercises the masked
    # partial-tile path — no padding copies anymore).
    x2 = jax.random.normal(k_x2, (3, 5, IN_FEATURES), jnp.float32)
    y2 = jax.block_until_ready(model(x2))
    assert y2.shape == (3, 5, OUT_FEATURES)
    assert jnp.allclose(y2, _reference(model, x2), atol=1e-3, rtol=1e-3)

    # Medium M: multi-step grid (megacore path) + masked partial last tile.
    x3 = jax.random.normal(k_x3, (300, IN_FEATURES), jnp.float32)
    y3 = jax.block_until_ready(model(x3))
    assert y3.shape == (300, OUT_FEATURES)
    assert jnp.allclose(y3, _reference(model, x3), atol=1e-3, rtol=1e-3)

    print("KERNEL_OK")
</pallas_src>

<mosaic_0001>
module attributes {stable_mosaic.version = 11 : i64} {
  func.func @_linear_kernel(%arg0: i32, %arg1: memref<16x1024xf32, #tpu.memory_space<vmem>>, %arg2: memref<1024x512xbf16, #tpu.memory_space<vmem>>, %arg3: memref<1x512xf32, #tpu.memory_space<vmem>>, %arg4: memref<16x512xf32, #tpu.memory_space<vmem>>) attributes {dimension_semantics = [#tpu.dimension_semantics<parallel>], iteration_bounds = array<i64: 1>, scalar_prefetch = 0 : i64, scratch_operands = 0 : i64, tpu.core_type = #tpu.core_type<tc>, window_params = [{transform_indices = @transform_0, window_bounds = array<i64: 16, 1024>}, {pipeline_mode = #tpu.pipeline_mode<synchronous>, transform_indices = @transform_1, window_bounds = array<i64: 1024, 512>}, {pipeline_mode = #tpu.pipeline_mode<synchronous>, transform_indices = @transform_2, window_bounds = array<i64: 1, 512>}, {transform_indices = @transform_3, window_bounds = array<i64: 16, 512>}]} {
    %c0 = arith.constant 0 : index
    %c0_0 = arith.constant 0 : index
    %0 = vector.load %arg1[%c0, %c0_0] : memref<16x1024xf32, #tpu.memory_space<vmem>>, vector<16x1024xf32>
    %1 = arith.truncf %0 : vector<16x1024xf32> to vector<16x1024xbf16>
    %c0_1 = arith.constant 0 : index
    %c0_2 = arith.constant 0 : index
    %2 = vector.load %arg2[%c0_1, %c0_2] : memref<1024x512xbf16, #tpu.memory_space<vmem>>, vector<1024x512xbf16>
    %cst = arith.constant dense<0.000000e+00> : vector<16x512xf32>
    %3 = tpu.matmul %1, %2, %cst {dimension_numbers = #tpu.dot_dimension_numbers<[1], [0], [0], [1], [0, 0, 1, 1], [], []>} : vector<16x1024xbf16>, vector<1024x512xbf16>, vector<16x512xf32> -> vector<16x512xf32>
    %c0_3 = arith.constant 0 : index
    %c0_4 = arith.constant 0 : index
    %4 = vector.load %arg3[%c0_3, %c0_4] : memref<1x512xf32, #tpu.memory_space<vmem>>, vector<1x512xf32>
    %5 = vector.broadcast %4 : vector<1x512xf32> to vector<16x512xf32>
    %6 = arith.addf %3, %5 : vector<16x512xf32>
    %c0_5 = arith.constant 0 : index
    %c0_6 = arith.constant 0 : index
    %7 = vector.load %arg4[%c0_5, %c0_6] : memref<16x512xf32, #tpu.memory_space<vmem>>, vector<16x512xf32>
    tpu.vector_store %arg4[%c0_5, %c0_6], %6 {strides = array<i32>} : memref<16x512xf32, #tpu.memory_space<vmem>>, vector<16x512xf32>,
    return
  }
  func.func @transform_0(%arg0: i32) -> (i32, i32) {
    %c0_i32 = arith.constant 0 : i32
    %c0_i32_0 = arith.constant 0 : i32
    return %arg0, %c0_i32 : i32, i32
  }
  func.func @transform_1(%arg0: i32) -> (i32, i32) {
    %c0_i32 = arith.constant 0 : i32
    %c0_i32_0 = arith.constant 0 : i32
    %c0_i32_1 = arith.constant 0 : i32
    return %c0_i32, %c0_i32_0 : i32, i32
  }
  func.func @transform_2(%arg0: i32) -> (i32, i32) {
    %c0_i32 = arith.constant 0 : i32
    %c0_i32_0 = arith.constant 0 : i32
    %c0_i32_1 = arith.constant 0 : i32
    return %c0_i32, %c0_i32_0 : i32, i32
  }
  func.func @transform_3(%arg0: i32) -> (i32, i32) {
    %c0_i32 = arith.constant 0 : i32
    %c0_i32_0 = arith.constant 0 : i32
    return %arg0, %c0_i32 : i32, i32
  }
}

</mosaic_0001>

<bundles_post_ra>
// kernel: tpu_custom_call.1
= control target key start
LH: loop header
LB: loop body
LE: loop exit
PB: predicated region body
PF: predicated region fallthrough
CT: control target
= control target key end

     0   :  { %8 = vsyncpa [#allocation3], 0  ;;  %s2816_s0 = inlined_call_operand.hbm [shape: f32[16,1024], index: 0, kind: input, shape index: {}]   ;;  %s2817_s1 = inlined_call_operand.hbm [shape: bf16[1024,512], index: 1, kind: input, shape index: {}]   ;;  %s2818_s2 = inlined_call_operand.vmem [shape: f32[1,512], index: 2, kind: input, shape index: {}]   ;;  %s2819_s3 = inlined_call_operand.hbm [shape: f32[16,512], index: 3, kind: output, shape index: {}]  }
   0x1   :  { %9 = vsyncpa [#allocation6], 0 }
   0x2   :  { %10 = vsyncpa [#allocation4], 0  ;;  %s2748_s12 = smov [#allocation2]   ;;  %s2676_s16 = scalar_lea.hbm %s2816_s0, 2048 }
   0x3   :  { %s16_s13 = sshll.u32 %s2748_s12, 4  ;;  %p2677_p0 = scmp.ne.s32.totalorder %s2816_s0, %s2676_s16  ;;  %s17_s13 = int_to_ptr.vmem [resolvable:$true] %s16_s13 }
   0x4   :  { %p2680_p1 = scmp.lt.u32.totalorder %s2676_s16, %s2816_s0 }
   0x6   :  { %p2682_p2 = pnand %p2680_p1, %p2677_p0 }
   0x8   :  { %2685 = shalt.err (!%p2682_p2)
}
   0x9   :  { %s2686_s21 = scalar_lea.vmem %s17_s13, 2048  ;;  %p2691_p4 = scmp.lt.s32.totalorder %s17_s13, %s17_s13 }
   0xa   :  { %p2687_p3 = scmp.ne.s32.totalorder %s17_s13, %s2686_s21  ;;  %p2692_p5 = scmp.lt.s32.totalorder %s2686_s21, %s2686_s21 }
   0xc   :  { %p2693_p6 = por %p2692_p5, %p2691_p4 }
   0xe   :  { %p2694_p7 = pnand %p2693_p6, %p2687_p3 }
  0x10   :  { %2697 = shalt.err (!%p2694_p7)
}
  0x11   :  { %s2749_s22 = smov 1024   ;;  %s2750_s23 = smov 64  }
  0x12   :  { %22 = dma.hbm_to_vmem [thread:$0]  %s2816_s0, 2048, %s17_s13, [#allocation3], %s2749_s22, %s2749_s22, %s2750_s23  }
  0x13   :  { %s2751_s26 = smov [#allocation5]   ;;  %s2698_s30 = scalar_lea.hbm %s2817_s1, 32768 }
  0x14   :  { %s28_s27 = sshll.u32 %s2751_s26, 4  ;;  %p2699_p8 = scmp.ne.s32.totalorder %s2817_s1, %s2698_s30  ;;  %s29_s27 = int_to_ptr.vmem [resolvable:$true] %s28_s27 }
  0x15   :  { %p2702_p9 = scmp.lt.u32.totalorder %s2698_s30, %s2817_s1 }
  0x17   :  { %p2704_p10 = pnand %p2702_p9, %p2699_p8 }
  0x19   :  { %2707 = shalt.err (!%p2704_p10)
}
  0x1a   :  { %s2708_s8 = scalar_lea.vmem %s29_s27, 32768  ;;  %p2713_p12 = scmp.lt.s32.totalorder %s29_s27, %s29_s27 }
  0x1b   :  { %p2709_p11 = scmp.ne.s32.totalorder %s29_s27, %s2708_s8  ;;  %p2714_p13 = scmp.lt.s32.totalorder %s2708_s8, %s2708_s8 }
  0x1d   :  { %p2715_p0 = por %p2714_p13, %p2713_p12 }
  0x1f   :  { %p2716_p1 = pnand %p2715_p0, %p2709_p11 }
  0x21   :  { %2719 = shalt.err (!%p2716_p1)
}
  0x22   :  { %s2752_s0 = smov 256   ;;  %s2753_s9 = smov 16  }
  0x23   :  { %34 = dma.hbm_to_vmem [thread:$0]  %s2817_s1, 32768, %s29_s27, [#allocation6], %s2752_s0, %s2752_s0, %s2753_s9  }
  0x24   :  { %2742 = dma.done.wait [#allocation3], 2048  }
  0x25   :  { %2743 = vsyncadd [#allocation3], 4294965248 }
  0x26   :  { %2744 = dma.done.wait [#allocation6], 32768  }
  0x27   :  { %2745 = vsyncadd [#allocation6], 4294934528  ;;  %v2292_v0 = vld [vmem:[#allocation5 + $0x4] ss:$16 sps:$4 sm:$0xff]   ;;  %v2294_v1 = vld [vmem:[#allocation5 + $0xc] ss:$16 sps:$4 sm:$0xff]  }
  0x28   :  { %1625 = vmatprep.subr.bf16.mxu0 %v2292_v0  ;;  %v2296_v2 = vld [vmem:[#allocation5] ss:$16 sps:$4 sm:$0xff]   ;;  %v2297_v3 = vld [vmem:[#allocation5 + $0x8] ss:$16 sps:$4 sm:$0xff]   ;;  %1797 = vmatprep.subr.bf16.mxu1 %v2294_v1  ;;  %v2298_v4 = vld [vmem:[#allocation5 + $0x24] ss:$16 sps:$4 sm:$0xff]  }
  0x29   :  { %1626 = vmatpush1.bf16.msra.mxu0 %v2296_v2  ;;  %1798 = vmatpush1.bf16.msra.mxu1 %v2297_v3  ;;  %v2300_v5 = vld [vmem:[#allocation5 + $0x2c] ss:$16 sps:$4 sm:$0xff]   ;;  %v2302_v6 = vld [vmem:[#allocation5 + $0x20] ss:$16 sps:$4 sm:$0xff]   ;;  %v2303_v7 = vld [vmem:[#allocation5 + $0x28] ss:$16 sps:$4 sm:$0xff]  }
  0x2a   :  { %1627 = vmatprep.subr.bf16.mxu0 %v2298_v4  ;;  %1799 = vmatprep.subr.bf16.mxu1 %v2300_v5  ;;  %v2304_v8 = vld [vmem:[#allocation5 + $0x44] ss:$16 sps:$4 sm:$0xff]   ;;  %v2306_v9 = vld [vmem:[#allocation5 + $0x4c] ss:$16 sps:$4 sm:$0xff]   ;;  %v2308_v10 = vld [vmem:[#allocation5 + $0x40] ss:$16 sps:$4 sm:$0xff]  }
  0x2b   :  { %v2309_v11 = vld [vmem:[#allocation5 + $0x48] ss:$16 sps:$4 sm:$0xff]   ;;  %v2310_v12 = vld [vmem:[#allocation5 + $0x64] ss:$16 sps:$4 sm:$0xff]   ;;  %v2312_v13 = vld [vmem:[#allocation5 + $0x6c] ss:$16 sps:$4 sm:$0xff]  }
  0x2c   :  { %v2314_v14 = vld [vmem:[#allocation5 + $0x60] ss:$16 sps:$4 sm:$0xff]   ;;  %v2315_v15 = vld [vmem:[#allocation5 + $0x68] ss:$16 sps:$4 sm:$0xff]   ;;  %v2316_v16 = vld [vmem:[#allocation5 + $0x84] ss:$16 sps:$4 sm:$0xff]  }
  0x2d   :  { %1628 = vmatpush1.bf16.msra.mxu0 %v2302_v6  ;;  %1800 = vmatpush1.bf16.msra.mxu1 %v2303_v7  ;;  %v2318_v17 = vld [vmem:[#allocation5 + $0x8c] ss:$16 sps:$4 sm:$0xff]   ;;  %v2320_v18 = vld [vmem:[#allocation5 + $0x80] ss:$16 sps:$4 sm:$0xff]   ;;  %v2321_v19 = vld [vmem:[#allocation5 + $0x88] ss:$16 sps:$4 sm:$0xff]  }
  0x2e   :  { %1629 = vmatprep.subr.bf16.mxu0 %v2304_v8  ;;  %1801 = vmatprep.subr.bf16.mxu1 %v2306_v9  ;;  %v2322_v20 = vld [vmem:[#allocation5 + $0xa4] ss:$16 sps:$4 sm:$0xff]   ;;  %v2324_v21 = vld [vmem:[#allocation5 + $0xac] ss:$16 sps:$4 sm:$0xff]   ;;  %v2326_v22 = vld [vmem:[#allocation5 + $0xa0] ss:$16 sps:$4 sm:$0xff]  }
  0x2f   :  { %v2327_v23 = vld [vmem:[#allocation5 + $0xa8] ss:$16 sps:$4 sm:$0xff]   ;;  %v2328_v24 = vld [vmem:[#allocation5 + $0xc4] ss:$16 sps:$4 sm:$0xff]   ;;  %v2330_v25 = vld [vmem:[#allocation5 + $0xcc] ss:$16 sps:$4 sm:$0xff]  }
  0x30   :  { %v2332_v26 = vld [vmem:[#allocation5 + $0xc0] ss:$16 sps:$4 sm:$0xff]   ;;  %v2333_v27 = vld [vmem:[#allocation5 + $0xc8] ss:$16 sps:$4 sm:$0xff]   ;;  %v2334_v28 = vld [vmem:[#allocation5 + $0xe4] ss:$16 sps:$4 sm:$0xff]  }
  0x31   :  { %1630 = vmatpush1.bf16.msra.mxu0 %v2308_v10  ;;  %1802 = vmatpush1.bf16.msra.mxu1 %v2309_v11  ;;  %v2336_v29 = vld [vmem:[#allocation5 + $0xec] ss:$16 sps:$4 sm:$0xff]   ;;  %v2338_v30 = vld [vmem:[#allocation5 + $0xe0] ss:$16 sps:$4 sm:$0xff]   ;;  %v2339_v31 = vld [vmem:[#allocation5 + $0xe8] ss:$16 sps:$4 sm:$0xff]  }
  0x32   :  { %1631 = vmatprep.subr.bf16.mxu0 %v2310_v12  ;;  %1803 = vmatprep.subr.bf16.mxu1 %v2312_v13  ;;  %v2340_v32 = vld [vmem:[#allocation5 + $0x104] ss:$16 sps:$4 sm:$0xff]   ;;  %v2342_v33 = vld [vmem:[#allocation5 + $0x10c] ss:$16 sps:$4 sm:$0xff]   ;;  %v2344_v34 = vld [vmem:[#allocation5 + $0x100] ss:$16 sps:$4 sm:$0xff]  }
  0x33   :  { %v2345_v35 = vld [vmem:[#allocation5 + $0x108] ss:$16 sps:$4 sm:$0xff]   ;;  %v2346_v36 = vld [vmem:[#allocation5 + $0x124] ss:$16 sps:$4 sm:$0xff]   ;;  %v2348_v37 = vld [vmem:[#allocation5 + $0x12c] ss:$16 sps:$4 sm:$0xff]  }
  0x34   :  { %v2350_v38 = vld [vmem:[#allocation5 + $0x120] ss:$16 sps:$4 sm:$0xff]   ;;  %v2351_v39 = vld [vmem:[#allocation5 + $0x128] ss:$16 sps:$4 sm:$0xff]   ;;  %v2352_v40 = vld [vmem:[#allocation5 + $0x144] ss:$16 sps:$4 sm:$0xff]  }
  0x35   :  { %1632 = vmatpush1.bf16.msra.mxu0 %v2314_v14  ;;  %1804 = vmatpush1.bf16.msra.mxu1 %v2315_v15  ;;  %v2354_v41 = vld [vmem:[#allocation5 + $0x14c] ss:$16 sps:$4 sm:$0xff]   ;;  %v2356_v42 = vld [vmem:[#allocation5 + $0x140] ss:$16 sps:$4 sm:$0xff]   ;;  %v2357_v43 = vld [vmem:[#allocation5 + $0x148] ss:$16 sps:$4 sm:$0xff]  }
  0x36   :  { %1633 = vmatprep.subr.bf16.mxu0 %v2316_v16  ;;  %1805 = vmatprep.subr.bf16.mxu1 %v2318_v17  ;;  %v2358_v44 = vld [vmem:[#allocation5 + $0x164] ss:$16 sps:$4 sm:$0xff]   ;;  %v2360_v45 = vld [vmem:[#allocation5 + $0x16c] ss:$16 sps:$4 sm:$0xff]   ;;  %v2362_v48 = vld [vmem:[#allocation5 + $0x160] ss:$16 sps:$4 sm:$0xff]  }
  0x37   :  { %v44_v46 = vld [vmem:[#allocation2 + $0x8] sm:$0xff]  ;;  %v2364_v51 = vld [vmem:[#allocation5 + $0x184] ss:$16 sps:$4 sm:$0xff]   ;;  %v2368_v53 = vld [vmem:[#allocation5 + $0x180] ss:$16 sps:$4 sm:$0xff]   ;;  %s2754_s13 = smov [#allocation7]  }
  0x38   :  { %v52_v47 = vld [vmem:[#allocation2 + $0x48] sm:$0xff]  ;;  %v2370_v55 = vld [vmem:[#allocation5 + $0x1a4] ss:$16 sps:$4 sm:$0xff]   ;;  %v2374_v57 = vld [vmem:[#allocation5 + $0x1a0] ss:$16 sps:$4 sm:$0xff]   ;;  %s1982_s14 = sshll.u32 %s2754_s13, 4  ;;  %s1983_s14 = int_to_ptr.vmem [resolvable:$true] %s1982_s14 }
  0x39   :  { %1634 = vmatpush1.bf16.msra.mxu0 %v2320_v18  ;;  %1806 = vmatpush1.bf16.msra.mxu1 %v2321_v19  ;;  %v2363_v49 = vld [vmem:[#allocation5 + $0x168] ss:$16 sps:$4 sm:$0xff]   ;;  %v60_v50 = vpack.c.bf16 %v52_v47, %v44_v46  ;;  %v2366_v52 = vld [vmem:[#allocation5 + $0x18c] ss:$16 sps:$4 sm:$0xff]   ;;  %v2376_v59 = vld [vmem:[#allocation5 + $0x1c4] ss:$16 sps:$4 sm:$0xff]   ;;  %p2725_p3 = scmp.lt.s32.totalorder %s1983_s14, %s1983_s14 }
  0x3a   :  { %1635 = vmatprep.subr.bf16.mxu0 %v2322_v20  ;;  %1807 = vmatprep.subr.bf16.mxu1 %v2324_v21  ;;  %v2369_v54 = vld [vmem:[#allocation5 + $0x188] ss:$16 sps:$4 sm:$0xff]   ;;  %v2372_v56 = vld [vmem:[#allocation5 + $0x1ac] ss:$16 sps:$4 sm:$0xff]   ;;  %v2380_v61 = vld [vmem:[#allocation5 + $0x1c0] ss:$16 sps:$4 sm:$0xff]  }
  0x3b   :  { %1657 = vmatprep.mubr.bf16.mxu0 %v60_v50  ;;  %1829 = vmatprep.mubr.bf16.mxu1 %v60_v50  ;;  %v2375_v58 = vld [vmem:[#allocation5 + $0x1a8] ss:$16 sps:$4 sm:$0xff]   ;;  %v2378_v60 = vld [vmem:[#allocation5 + $0x1cc] ss:$16 sps:$4 sm:$0xff]   ;;  %v2382_v63 = vld [vmem:[#allocation5 + $0x1e4] ss:$16 sps:$4 sm:$0xff]  }
  0x3c   :  { %v2381_v62 = vld [vmem:[#allocation5 + $0x1c8] ss:$16 sps:$4 sm:$0xff]   ;;  %v2384_v0 = vld [vmem:[#allocation5 + $0x1ec] ss:$16 sps:$4 sm:$0xff]   ;;  %v2386_v1 = vld [vmem:[#allocation5 + $0x1e0] ss:$16 sps:$4 sm:$0xff]  }
  0x3d   :  { %1636 = vmatpush1.bf16.msra.mxu0 %v2326_v22  ;;  %1808 = vmatpush1.bf16.msra.mxu1 %v2327_v23  ;;  %v2387_v2 = vld [vmem:[#allocation5 + $0x1e8] ss:$16 sps:$4 sm:$0xff]   ;;  %v2390_v3 = vld [vmem:[#allocation5 + $0x204] ss:$16 sps:$4 sm:$0xff]   ;;  %v2393_v6 = vld [vmem:[#allocation5 + $0x20c] ss:$16 sps:$4 sm:$0xff]  }
  0x3e   :  { %1637 = vmatprep.subr.bf16.mxu0 %v2328_v24  ;;  %1809 = vmatprep.subr.bf16.mxu1 %v2330_v25  ;;  %v43_v4 = vld [vmem:[#allocation2] sm:$0xff]  ;;  %v2391_v8 = vld [vmem:[#allocation5 + $0x208] ss:$16 sps:$4 sm:$0xff]   ;;  %v2399_v11 = vld [vmem:[#allocation5 + $0x22c] ss:$16 sps:$4 sm:$0xff]  }
  0x3f   :  { %v51_v5 = vld [vmem:[#allocation2 + $0x40] sm:$0xff]  ;;  %v2397_v13 = vld [vmem:[#allocation5 + $0x228] ss:$16 sps:$4 sm:$0xff]   ;;  %v2405_v15 = vld [vmem:[#allocation5 + $0x24c] ss:$16 sps:$4 sm:$0xff]  }
  0x40   :  { %v2388_v7 = vld [vmem:[#allocation5 + $0x200] ss:$16 sps:$4 sm:$0xff]   ;;  %v59_v9 = vpack.c.bf16 %v51_v5, %v43_v4  ;;  %v2396_v10 = vld [vmem:[#allocation5 + $0x224] ss:$16 sps:$4 sm:$0xff]   ;;  %v2403_v17 = vld [vmem:[#allocation5 + $0x248] ss:$16 sps:$4 sm:$0xff]  }
  0x41   :  { %1638 = vmatpush1.bf16.msra.mxu0 %v2332_v26  ;;  %1810 = vmatpush1.bf16.msra.mxu1 %v2333_v27  ;;  %v2394_v12 = vld [vmem:[#allocation5 + $0x220] ss:$16 sps:$4 sm:$0xff]   ;;  %v2402_v14 = vld [vmem:[#allocation5 + $0x244] ss:$16 sps:$4 sm:$0xff]   ;;  %v2411_v19 = vld [vmem:[#allocation5 + $0x26c] ss:$16 sps:$4 sm:$0xff]  }
  0x42   :  { %1639 = vmatprep.subr.bf16.mxu0 %v2334_v28  ;;  %1811 = vmatprep.subr.bf16.mxu1 %v2336_v29  ;;  %v2400_v16 = vld [vmem:[#allocation5 + $0x240] ss:$16 sps:$4 sm:$0xff]   ;;  %v2408_v18 = vld [vmem:[#allocation5 + $0x264] ss:$16 sps:$4 sm:$0xff]   ;;  %v2409_v21 = vld [vmem:[#allocation5 + $0x268] ss:$16 sps:$4 sm:$0xff]  }
  0x43   :  { %v2406_v20 = vld [vmem:[#allocation5 + $0x260] ss:$16 sps:$4 sm:$0xff]   ;;  %v2414_v22 = vld [vmem:[#allocation5 + $0x284] ss:$16 sps:$4 sm:$0xff]   ;;  %v2417_v23 = vld [vmem:[#allocation5 + $0x28c] ss:$16 sps:$4 sm:$0xff]  }
  0x44   :  { %v2412_v24 = vld [vmem:[#allocation5 + $0x280] ss:$16 sps:$4 sm:$0xff]   ;;  %v2415_v25 = vld [vmem:[#allocation5 + $0x288] ss:$16 sps:$4 sm:$0xff]   ;;  %v2420_v26 = vld [vmem:[#allocation5 + $0x2a4] ss:$16 sps:$4 sm:$0xff]  }
  0x45   :  { %1640 = vmatpush1.bf16.msra.mxu0 %v2338_v30  ;;  %1812 = vmatpush1.bf16.msra.mxu1 %v2339_v31  ;;  %v2423_v27 = vld [vmem:[#allocation5 + $0x2ac] ss:$16 sps:$4 sm:$0xff]   ;;  %v2418_v28 = vld [vmem:[#allocation5 + $0x2a0] ss:$16 sps:$4 sm:$0xff]   ;;  %v2421_v29 = vld [vmem:[#allocation5 + $0x2a8] ss:$16 sps:$4 sm:$0xff]  }
  0x46   :  { %1641 = vmatprep.subr.bf16.mxu0 %v2340_v32  ;;  %1813 = vmatprep.subr.bf16.mxu1 %v2342_v33  ;;  %v2426_v30 = vld [vmem:[#allocation5 + $0x2c4] ss:$16 sps:$4 sm:$0xff]   ;;  %v2429_v31 = vld [vmem:[#allocation5 + $0x2cc] ss:$16 sps:$4 sm:$0xff]   ;;  %v2442_v47 = vld [vmem:[#allocation5 + $0x320] ss:$16 sps:$4 sm:$0xff]  }
  0x47   :  { %v46_v32 = vld [vmem:[#allocation2 + $0x18] sm:$0xff]  ;;  %v2480_v5 = vld [vmem:[#allocation5 + $0x3e4] ss:$16 sps:$4 sm:$0xff]  }
  0x48   :  { %v54_v33 = vld [vmem:[#allocation2 + $0x58] sm:$0xff] }
  0x49   :  { %1642 = vmatpush1.bf16.msra.mxu0 %v2344_v34  ;;  %1814 = vmatpush1.bf16.msra.mxu1 %v2345_v35  ;;  %v2424_v34 = vld [vmem:[#allocation5 + $0x2c0] ss:$16 sps:$4 sm:$0xff]   ;;  %v2427_v35 = vld [vmem:[#allocation5 + $0x2c8] ss:$16 sps:$4 sm:$0xff]   ;;  %v2447_v46 = vld [vmem:[#allocation5 + $0x32c] ss:$16 sps:$4 sm:$0xff]  }
  0x4a   :  { %1643 = vmatprep.subr.bf16.mxu0 %v2346_v36  ;;  %1815 = vmatprep.subr.bf16.mxu1 %v2348_v37  ;;  %v62_v36 = vpack.c.bf16 %v54_v33, %v46_v32  ;;  %v2432_v37 = vld [vmem:[#allocation5 + $0x2e4] ss:$16 sps:$4 sm:$0xff]   ;;  %v2453_v50 = vld [vmem:[#allocation5 + $0x34c] ss:$16 sps:$4 sm:$0xff]   ;;  %v2475_v4 = vld [vmem:[#allocation5 + $0x3c8] ss:$16 sps:$4 sm:$0xff]  }
  0x4b   :  { %v2513_v32 = vld [vmem:[#allocation5 + $0x48c] ss:$16 sps:$4 sm:$0xff]   ;;  %v2508_v33 = vld [vmem:[#allocation5 + $0x480] ss:$16 sps:$4 sm:$0xff]  }
  0x4d   :  { %1644 = vmatpush1.bf16.msra.mxu0 %v2350_v38  ;;  %1816 = vmatpush1.bf16.msra.mxu1 %v2351_v39  ;;  %v2435_v38 = vld [vmem:[#allocation5 + $0x2ec] ss:$16 sps:$4 sm:$0xff]   ;;  %v2430_v39 = vld [vmem:[#allocation5 + $0x2e0] ss:$16 sps:$4 sm:$0xff]  }
  0x4e   :  { %1645 = vmatprep.subr.bf16.mxu0 %v2352_v40  ;;  %1817 = vmatprep.subr.bf16.mxu1 %v2354_v41  ;;  %v2433_v40 = vld [vmem:[#allocation5 + $0x2e8] ss:$16 sps:$4 sm:$0xff]   ;;  %v2438_v41 = vld [vmem:[#allocation5 + $0x304] ss:$16 sps:$4 sm:$0xff]  }
  0x51   :  { %1646 = vmatpush1.bf16.msra.mxu0 %v2356_v42  ;;  %1818 = vmatpush1.bf16.msra.mxu1 %v2357_v43  ;;  %v2441_v42 = vld [vmem:[#allocation5 + $0x30c] ss:$16 sps:$4 sm:$0xff]   ;;  %v2436_v43 = vld [vmem:[#allocation5 + $0x300] ss:$16 sps:$4 sm:$0xff]  }
  0x52   :  { %1647 = vmatprep.subr.bf16.mxu0 %v2358_v44  ;;  %1819 = vmatprep.subr.bf16.mxu1 %v2360_v45  ;;  %v2439_v44 = vld [vmem:[#allocation5 + $0x308] ss:$16 sps:$4 sm:$0xff]   ;;  %v2444_v45 = vld [vmem:[#allocation5 + $0x324] ss:$16 sps:$4 sm:$0xff]  }
  0x55   :  { %1648 = vmatpush1.bf16.msra.mxu0 %v2362_v48  ;;  %1820 = vmatpush1.bf16.msra.mxu1 %v2363_v49  ;;  %v2445_v48 = vld [vmem:[#allocation5 + $0x328] ss:$16 sps:$4 sm:$0xff]   ;;  %v2450_v49 = vld [vmem:[#allocation5 + $0x344] ss:$16 sps:$4 sm:$0xff]  }
  0x56   :  { %1649 = vmatprep.subr.bf16.mxu0 %v2364_v51  ;;  %1821 = vmatprep.subr.bf16.mxu1 %v2366_v52  ;;  %v2448_v51 = vld [vmem:[#allocation5 + $0x340] ss:$16 sps:$4 sm:$0xff]   ;;  %v2451_v52 = vld [vmem:[#allocation5 + $0x348] ss:$16 sps:$4 sm:$0xff]  }
  0x59   :  { %1650 = vmatpush1.bf16.msra.mxu0 %v2368_v53  ;;  %1822 = vmatpush1.bf16.msra.mxu1 %v2369_v54  ;;  %v2456_v53 = vld [vmem:[#allocation5 + $0x364] ss:$16 sps:$4 sm:$0xff]   ;;  %v2459_v54 = vld [vmem:[#allocation5 + $0x36c] ss:$16 sps:$4 sm:$0xff]  }
  0x5a   :  { %1651 = vmatprep.subr.bf16.mxu0 %v2370_v55  ;;  %1823 = vmatprep.subr.bf16.mxu1 %v2372_v56  ;;  %v2454_v55 = vld [vmem:[#allocation5 + $0x360] ss:$16 sps:$4 sm:$0xff]   ;;  %v2457_v56 = vld [vmem:[#allocation5 + $0x368] ss:$16 sps:$4 sm:$0xff]  }
  0x5d   :  { %1652 = vmatpush1.bf16.msra.mxu0 %v2374_v57  ;;  %1824 = vmatpush1.bf16.msra.mxu1 %v2375_v58  ;;  %v2462_v57 = vld [vmem:[#allocation5 + $0x384] ss:$16 sps:$4 sm:$0xff]   ;;  %v2465_v58 = vld [vmem:[#allocation5 + $0x38c] ss:$16 sps:$4 sm:$0xff]  }
  0x5e   :  { %1653 = vmatprep.subr.bf16.mxu0 %v2376_v59  ;;  %1825 = vmatprep.subr.bf16.mxu1 %v2378_v60  ;;  %v2460_v59 = vld [vmem:[#allocation5 + $0x380] ss:$16 sps:$4 sm:$0xff]   ;;  %v2463_v60 = vld [vmem:[#allocation5 + $0x388] ss:$16 sps:$4 sm:$0xff]  }
  0x61   :  { %1654 = vmatpush1.bf16.msra.mxu0 %v2380_v61  ;;  %1826 = vmatpush1.bf16.msra.mxu1 %v2381_v62  ;;  %v2468_v61 = vld [vmem:[#allocation5 + $0x3a4] ss:$16 sps:$4 sm:$0xff]   ;;  %v2471_v62 = vld [vmem:[#allocation5 + $0x3ac] ss:$16 sps:$4 sm:$0xff]  }
  0x62   :  { %1655 = vmatprep.subr.bf16.mxu0 %v2382_v63  ;;  %1827 = vmatprep.subr.bf16.mxu1 %v2384_v0  ;;  %v2466_v63 = vld [vmem:[#allocation5 + $0x3a0] ss:$16 sps:$4 sm:$0xff]   ;;  %v2469_v0 = vld [vmem:[#allocation5 + $0x3a8] ss:$16 sps:$4 sm:$0xff]  }
  0x65   :  { %1656 = vmatpush1.bf16.msra.mxu0 %v2386_v1  ;;  %1828 = vmatpush1.bf16.msra.mxu1 %v2387_v2  ;;  %v2474_v1 = vld [vmem:[#allocation5 + $0x3c4] ss:$16 sps:$4 sm:$0xff]   ;;  %v2477_v2 = vld [vmem:[#allocation5 + $0x3cc] ss:$16 sps:$4 sm:$0xff]  }
  0x66   :  { %1668 = vmatprep.subr.bf16.mxu0 %v2390_v3  ;;  %1840 = vmatprep.subr.bf16.mxu1 %v2393_v6  ;;  %v2472_v3 = vld [vmem:[#allocation5 + $0x3c0] ss:$16 sps:$4 sm:$0xff]   ;;  %v2483_v6 = vld [vmem:[#allocation5 + $0x3ec] ss:$16 sps:$4 sm:$0xff]  }
  0x68   :  { %1658 = vmatmul.mubr.bf16.vlgmr.msra.gmra.mrb[0].mxu0 %v59_v9  ;;  %1830 = vmatmul.mubr.bf16.vlgmr.msra.gmra.mrb[0].mxu1 %v59_v9  ;;  %v2486_v9 = vld [vmem:[#allocation5 + $0x404] ss:$16 sps:$4 sm:$0xff]  }
  0x69   :  { %1669 = vmatpush1.bf16.msra.mxu0 %v2388_v7  ;;  %1841 = vmatpush1.bf16.msra.mxu1 %v2391_v8  ;;  %v2478_v7 = vld [vmem:[#allocation5 + $0x3e0] ss:$16 sps:$4 sm:$0xff]   ;;  %v2481_v8 = vld [vmem:[#allocation5 + $0x3e8] ss:$16 sps:$4 sm:$0xff]  }
  0x6a   :  { %1670 = vmatprep.subr.bf16.mxu0 %v2396_v10  ;;  %1842 = vmatprep.subr.bf16.mxu1 %v2399_v11  ;;  %v45_v10 = vld [vmem:[#allocation2 + $0x10] sm:$0xff] }
  0x6b   :  { %1700 = vmatprep.mubr.bf16.mxu0 %v62_v36  ;;  %1872 = vmatprep.mubr.bf16.mxu1 %v62_v36  ;;  %v53_v11 = vld [vmem:[#allocation2 + $0x50] sm:$0xff]  ;;  %v2519_v36 = vld [vmem:[#allocation5 + $0x4ac] ss:$16 sps:$4 sm:$0xff]  }
  0x6d   :  { %1671 = vmatpush1.bf16.msra.mxu0 %v2394_v12  ;;  %1843 = vmatpush1.bf16.msra.mxu1 %v2397_v13  ;;  %v2489_v12 = vld [vmem:[#allocation5 + $0x40c] ss:$16 sps:$4 sm:$0xff]   ;;  %v2484_v13 = vld [vmem:[#allocation5 + $0x400] ss:$16 sps:$4 sm:$0xff]  }
  0x6e   :  { %1672 = vmatprep.subr.bf16.mxu0 %v2402_v14  ;;  %1844 = vmatprep.subr.bf16.mxu1 %v2405_v15  ;;  %v2487_v14 = vld [vmem:[#allocation5 + $0x408] ss:$16 sps:$4 sm:$0xff]   ;;  %v61_v15 = vpack.c.bf16 %v53_v11, %v45_v10  ;;  %v2576_v11 = vld [vmem:[#allocation5 + $0x5e4] ss:$16 sps:$4 sm:$0xff]  }
  0x6f   :  { %v2571_v10 = vld [vmem:[#allocation5 + $0x5c8] ss:$16 sps:$4 sm:$0xff]  }
  0x71   :  { %1673 = vmatpush1.bf16.msra.mxu0 %v2400_v16  ;;  %1845 = vmatpush1.bf16.msra.mxu1 %v2403_v17  ;;  %v2492_v16 = vld [vmem:[#allocation5 + $0x424] ss:$16 sps:$4 sm:$0xff]   ;;  %v2495_v17 = vld [vmem:[#allocation5 + $0x42c] ss:$16 sps:$4 sm:$0xff]  }
  0x72   :  { %1674 = vmatprep.subr.bf16.mxu0 %v2408_v18  ;;  %1846 = vmatprep.subr.bf16.mxu1 %v2411_v19  ;;  %v48_v18 = vld [vmem:[#allocation2 + $0x28] sm:$0xff] }
  0x73   :  { %v56_v19 = vld [vmem:[#allocation2 + $0x68] sm:$0xff] }
  0x75   :  { %1675 = vmatpush1.bf16.msra.mxu0 %v2406_v20  ;;  %1847 = vmatpush1.bf16.msra.mxu1 %v2409_v21  ;;  %v2490_v20 = vld [vmem:[#allocation5 + $0x420] ss:$16 sps:$4 sm:$0xff]   ;;  %v2493_v21 = vld [vmem:[#allocation5 + $0x428] ss:$16 sps:$4 sm:$0xff]  }
  0x76   :  { %1676 = vmatprep.subr.bf16.mxu0 %v2414_v22  ;;  %1848 = vmatprep.subr.bf16.mxu1 %v2417_v23  ;;  %v64_v22 = vpack.c.bf16 %v56_v19, %v48_v18  ;;  %v2498_v23 = vld [vmem:[#allocation5 + $0x444] ss:$16 sps:$4 sm:$0xff]   ;;  %v2585_v18 = vld [vmem:[#allocation5 + $0x60c] ss:$16 sps:$4 sm:$0xff]  }
  0x79   :  { %1677 = vmatpush1.bf16.msra.mxu0 %v2412_v24  ;;  %1849 = vmatpush1.bf16.msra.mxu1 %v2415_v25  ;;  %v2501_v24 = vld [vmem:[#allocation5 + $0x44c] ss:$16 sps:$4 sm:$0xff]   ;;  %v2496_v25 = vld [vmem:[#allocation5 + $0x440] ss:$16 sps:$4 sm:$0xff]  }
  0x7a   :  { %1678 = vmatprep.subr.bf16.mxu0 %v2420_v26  ;;  %1850 = vmatprep.subr.bf16.mxu1 %v2423_v27  ;;  %v2499_v26 = vld [vmem:[#allocation5 + $0x448] ss:$16 sps:$4 sm:$0xff]   ;;  %v2504_v27 = vld [vmem:[#allocation5 + $0x464] ss:$16 sps:$4 sm:$0xff]  }
  0x7d   :  { %1679 = vmatpush1.bf16.msra.mxu0 %v2418_v28  ;;  %1851 = vmatpush1.bf16.msra.mxu1 %v2421_v29  ;;  %v2507_v28 = vld [vmem:[#allocation5 + $0x46c] ss:$16 sps:$4 sm:$0xff]   ;;  %v2502_v29 = vld [vmem:[#allocation5 + $0x460] ss:$16 sps:$4 sm:$0xff]  }
  0x7e   :  { %1680 = vmatprep.subr.bf16.mxu0 %v2426_v30  ;;  %1852 = vmatprep.subr.bf16.mxu1 %v2429_v31  ;;  %v2505_v30 = vld [vmem:[#allocation5 + $0x468] ss:$16 sps:$4 sm:$0xff]   ;;  %v2510_v31 = vld [vmem:[#allocation5 + $0x484] ss:$16 sps:$4 sm:$0xff]  }
  0x81   :  { %1681 = vmatpush1.bf16.msra.mxu0 %v2424_v34  ;;  %1853 = vmatpush1.bf16.msra.mxu1 %v2427_v35  ;;  %v2511_v34 = vld [vmem:[#allocation5 + $0x488] ss:$16 sps:$4 sm:$0xff]   ;;  %v2516_v35 = vld [vmem:[#allocation5 + $0x4a4] ss:$16 sps:$4 sm:$0xff]  }
  0x82   :  { %1682 = vmatprep.subr.bf16.mxu0 %v2432_v37  ;;  %1854 = vmatprep.subr.bf16.mxu1 %v2435_v38  ;;  %v2514_v37 = vld [vmem:[#allocation5 + $0x4a0] ss:$16 sps:$4 sm:$0xff]   ;;  %v2517_v38 = vld [vmem:[#allocation5 + $0x4a8] ss:$16 sps:$4 sm:$0xff]  }
  0x85   :  { %1683 = vmatpush1.bf16.msra.mxu0 %v2430_v39  ;;  %1855 = vmatpush1.bf16.msra.mxu1 %v2433_v40  ;;  %v2522_v39 = vld [vmem:[#allocation5 + $0x4c4] ss:$16 sps:$4 sm:$0xff]   ;;  %v2525_v40 = vld [vmem:[#allocation5 + $0x4cc] ss:$16 sps:$4 sm:$0xff]  }
  0x86   :  { %1684 = vmatprep.subr.bf16.mxu0 %v2438_v41  ;;  %1856 = vmatprep.subr.bf16.mxu1 %v2441_v42  ;;  %v2520_v41 = vld [vmem:[#allocation5 + $0x4c0] ss:$16 sps:$4 sm:$0xff]   ;;  %v2523_v42 = vld [vmem:[#allocation5 + $0x4c8] ss:$16 sps:$4 sm:$0xff]  }
  0x89   :  { %1685 = vmatpush1.bf16.msra.mxu0 %v2436_v43  ;;  %1857 = vmatpush1.bf16.msra.mxu1 %v2439_v44  ;;  %v2528_v43 = vld [vmem:[#allocation5 + $0x4e4] ss:$16 sps:$4 sm:$0xff]   ;;  %v2531_v44 = vld [vmem:[#allocation5 + $0x4ec] ss:$16 sps:$4 sm:$0xff]  }
  0x8a   :  { %1686 = vmatprep.subr.bf16.mxu0 %v2444_v45  ;;  %1858 = vmatprep.subr.bf16.mxu1 %v2447_v46  ;;  %v2526_v45 = vld [vmem:[#allocation5 + $0x4e0] ss:$16 sps:$4 sm:$0xff]   ;;  %v2529_v46 = vld [vmem:[#allocation5 + $0x4e8] ss:$16 sps:$4 sm:$0xff]  }
  0x8d   :  { %1687 = vmatpush1.bf16.msra.mxu0 %v2442_v47  ;;  %1859 = vmatpush1.bf16.msra.mxu1 %v2445_v48  ;;  %v2534_v47 = vld [vmem:[#allocation5 + $0x504] ss:$16 sps:$4 sm:$0xff]   ;;  %v2537_v48 = vld [vmem:[#allocation5 + $0x50c] ss:$16 sps:$4 sm:$0xff]  }
  0x8e   :  { %1688 = vmatprep.subr.bf16.mxu0 %v2450_v49  ;;  %1860 = vmatprep.subr.bf16.mxu1 %v2453_v50  ;;  %v2532_v49 = vld [vmem:[#allocation5 + $0x500] ss:$16 sps:$4 sm:$0xff]   ;;  %v2535_v50 = vld [vmem:[#allocation5 + $0x508] ss:$16 sps:$4 sm:$0xff]  }
  0x91   :  { %1689 = vmatpush1.bf16.msra.mxu0 %v2448_v51  ;;  %1861 = vmatpush1.bf16.msra.mxu1 %v2451_v52  ;;  %v2540_v51 = vld [vmem:[#allocation5 + $0x524] ss:$16 sps:$4 sm:$0xff]   ;;  %v2543_v52 = vld [vmem:[#allocation5 + $0x52c] ss:$16 sps:$4 sm:$0xff]  }
  0x92   :  { %1690 = vmatprep.subr.bf16.mxu0 %v2456_v53  ;;  %1862 = vmatprep.subr.bf16.mxu1 %v2459_v54  ;;  %v2538_v53 = vld [vmem:[#allocation5 + $0x520] ss:$16 sps:$4 sm:$0xff]   ;;  %v2541_v54 = vld [vmem:[#allocation5 + $0x528] ss:$16 sps:$4 sm:$0xff]  }
  0x95   :  { %1691 = vmatpush1.bf16.msra.mxu0 %v2454_v55  ;;  %1863 = vmatpush1.bf16.msra.mxu1 %v2457_v56  ;;  %v2546_v55 = vld [vmem:[#allocation5 + $0x544] ss:$16 sps:$4 sm:$0xff]   ;;  %v2549_v56 = vld [vmem:[#allocation5 + $0x54c] ss:$16 sps:$4 sm:$0xff]  }
  0x96   :  { %1692 = vmatprep.subr.bf16.mxu0 %v2462_v57  ;;  %1864 = vmatprep.subr.bf16.mxu1 %v2465_v58  ;;  %v2544_v57 = vld [vmem:[#allocation5 + $0x540] ss:$16 sps:$4 sm:$0xff]   ;;  %v2547_v58 = vld [vmem:[#allocation5 + $0x548] ss:$16 sps:$4 sm:$0xff]  }
  0x99   :  { %1693 = vmatpush1.bf16.msra.mxu0 %v2460_v59  ;;  %1865 = vmatpush1.bf16.msra.mxu1 %v2463_v60  ;;  %v2552_v59 = vld [vmem:[#allocation5 + $0x564] ss:$16 sps:$4 sm:$0xff]   ;;  %v2555_v60 = vld [vmem:[#allocation5 + $0x56c] ss:$16 sps:$4 sm:$0xff]  }
  0x9a   :  { %1694 = vmatprep.subr.bf16.mxu0 %v2468_v61  ;;  %1866 = vmatprep.subr.bf16.mxu1 %v2471_v62  ;;  %v2550_v61 = vld [vmem:[#allocation5 + $0x560] ss:$16 sps:$4 sm:$0xff]   ;;  %v2553_v62 = vld [vmem:[#allocation5 + $0x568] ss:$16 sps:$4 sm:$0xff]  }
  0x9d   :  { %1695 = vmatpush1.bf16.msra.mxu0 %v2466_v63  ;;  %1867 = vmatpush1.bf16.msra.mxu1 %v2469_v0  ;;  %v2558_v63 = vld [vmem:[#allocation5 + $0x584] ss:$16 sps:$4 sm:$0xff]   ;;  %v2561_v0 = vld [vmem:[#allocation5 + $0x58c] ss:$16 sps:$4 sm:$0xff]  }
  0x9e   :  { %1696 = vmatprep.subr.bf16.mxu0 %v2474_v1  ;;  %1868 = vmatprep.subr.bf16.mxu1 %v2477_v2  ;;  %v2556_v1 = vld [vmem:[#allocation5 + $0x580] ss:$16 sps:$4 sm:$0xff]   ;;  %v2559_v2 = vld [vmem:[#allocation5 + $0x588] ss:$16 sps:$4 sm:$0xff]  }
  0xa1   :  { %1697 = vmatpush1.bf16.msra.mxu0 %v2472_v3  ;;  %1869 = vmatpush1.bf16.msra.mxu1 %v2475_v4  ;;  %v2564_v3 = vld [vmem:[#allocation5 + $0x5a4] ss:$16 sps:$4 sm:$0xff]   ;;  %v2567_v4 = vld [vmem:[#allocation5 + $0x5ac] ss:$16 sps:$4 sm:$0xff]  }
  0xa2   :  { %1698 = vmatprep.subr.bf16.mxu0 %v2480_v5  ;;  %1870 = vmatprep.subr.bf16.mxu1 %v2483_v6  ;;  %v2562_v5 = vld [vmem:[#allocation5 + $0x5a0] ss:$16 sps:$4 sm:$0xff]   ;;  %v2565_v6 = vld [vmem:[#allocation5 + $0x5a8] ss:$16 sps:$4 sm:$0xff]  }
  0xa5   :  { %1699 = vmatpush1.bf16.msra.mxu0 %v2478_v7  ;;  %1871 = vmatpush1.bf16.msra.mxu1 %v2481_v8  ;;  %v2570_v7 = vld [vmem:[#allocation5 + $0x5c4] ss:$16 sps:$4 sm:$0xff]   ;;  %v2573_v8 = vld [vmem:[#allocation5 + $0x5cc] ss:$16 sps:$4 sm:$0xff]  }
  0xa6   :  { %1711 = vmatprep.subr.bf16.mxu0 %v2486_v9  ;;  %1883 = vmatprep.subr.bf16.mxu1 %v2489_v12  ;;  %v2568_v9 = vld [vmem:[#allocation5 + $0x5c0] ss:$16 sps:$4 sm:$0xff]   ;;  %v2579_v12 = vld [vmem:[#allocation5 + $0x5ec] ss:$16 sps:$4 sm:$0xff]  }
  0xa8   :  { %1701 = vmatmul.mubr.bf16.vlgmr.msra.gmra.mrb[0].mxu0 %v61_v15  ;;  %1873 = vmatmul.mubr.bf16.vlgmr.msra.gmra.mrb[0].mxu1 %v61_v15  ;;  %v47_v15 = vld [vmem:[#allocation2 + $0x20] sm:$0xff] }
  0xa9   :  { %1712 = vmatpush1.bf16.msra.mxu0 %v2484_v13  ;;  %1884 = vmatpush1.bf16.msra.mxu1 %v2487_v14  ;;  %v2574_v13 = vld [vmem:[#allocation5 + $0x5e0] ss:$16 sps:$4 sm:$0xff]   ;;  %v2577_v14 = vld [vmem:[#allocation5 + $0x5e8] ss:$16 sps:$4 sm:$0xff]  }
  0xaa   :  { %1713 = vmatprep.subr.bf16.mxu0 %v2492_v16  ;;  %1885 = vmatprep.subr.bf16.mxu1 %v2495_v17  ;;  %v55_v16 = vld [vmem:[#allocation2 + $0x60] sm:$0xff] }
  0xab   :  { %1743 = vmatprep.mubr.bf16.mxu0 %v64_v22  ;;  %1915 = vmatprep.mubr.bf16.mxu1 %v64_v22  ;;  %v2582_v17 = vld [vmem:[#allocation5 + $0x604] ss:$16 sps:$4 sm:$0xff]   ;;  %v63_v19 = vpack.c.bf16 %v55_v16, %v47_v15  ;;  %v2580_v22 = vld [vmem:[#allocation5 + $0x600] ss:$16 sps:$4 sm:$0xff]   ;;  %v2667_v16 = vld [vmem:[#allocation5 + $0x7c8] ss:$16 sps:$4 sm:$0xff]  }
  0xac   :  { %v2664_v15 = vld [vmem:[#allocation5 + $0x7c0] ss:$16 sps:$4 sm:$0xff]  }
  0xad   :  { %1714 = vmatpush1.bf16.msra.mxu0 %v2490_v20  ;;  %1886 = vmatpush1.bf16.msra.mxu1 %v2493_v21  ;;  %v50_v20 = vld [vmem:[#allocation2 + $0x38] sm:$0xff] }
  0xae   :  { %1715 = vmatprep.subr.bf16.mxu0 %v2498_v23  ;;  %1887 = vmatprep.subr.bf16.mxu1 %v2501_v24  ;;  %v58_v21 = vld [vmem:[#allocation2 + $0x78] sm:$0xff]  ;;  %v2588_v24 = vld [vmem:[#allocation5 + $0x624] ss:$16 sps:$4 sm:$0xff]  }
  0xaf   :  { %v2583_v23 = vld [vmem:[#allocation5 + $0x608] ss:$16 sps:$4 sm:$0xff]  }
  0xb1   :  { %1716 = vmatpush1.bf16.msra.mxu0 %v2496_v25  ;;  %1888 = vmatpush1.bf16.msra.mxu1 %v2499_v26  ;;  %v2591_v25 = vld [vmem:[#allocation5 + $0x62c] ss:$16 sps:$4 sm:$0xff]   ;;  %v66_v26 = vpack.c.bf16 %v58_v21, %v50_v20  ;;  %v2673_v20 = vld [vmem:[#allocation5 + $0x7e8] ss:$16 sps:$4 sm:$0xff]   ;;  %v49_v21 = vld [vmem:[#allocation2 + $0x30] sm:$0xff] }
  0xb2   :  { %1717 = vmatprep.subr.bf16.mxu0 %v2504_v27  ;;  %1889 = vmatprep.subr.bf16.mxu1 %v2507_v28  ;;  %v2586_v27 = vld [vmem:[#allocation5 + $0x620] ss:$16 sps:$4 sm:$0xff]   ;;  %v2589_v28 = vld [vmem:[#allocation5 + $0x628] ss:$16 sps:$4 sm:$0xff]  }
  0xb5   :  { %1718 = vmatpush1.bf16.msra.mxu0 %v2502_v29  ;;  %1890 = vmatpush1.bf16.msra.mxu1 %v2505_v30  ;;  %v2594_v29 = vld [vmem:[#allocation5 + $0x644] ss:$16 sps:$4 sm:$0xff]   ;;  %v2597_v30 = vld [vmem:[#allocation5 + $0x64c] ss:$16 sps:$4 sm:$0xff]  }
  0xb6   :  { %1719 = vmatprep.subr.bf16.mxu0 %v2510_v31  ;;  %1891 = vmatprep.subr.bf16.mxu1 %v2513_v32  ;;  %v2592_v31 = vld [vmem:[#allocation5 + $0x640] ss:$16 sps:$4 sm:$0xff]   ;;  %v2595_v32 = vld [vmem:[#allocation5 + $0x648] ss:$16 sps:$4 sm:$0xff]  }
  0xb9   :  { %1720 = vmatpush1.bf16.msra.mxu0 %v2508_v33  ;;  %1892 = vmatpush1.bf16.msra.mxu1 %v2511_v34  ;;  %v2600_v33 = vld [vmem:[#allocation5 + $0x664] ss:$16 sps:$4 sm:$0xff]   ;;  %v2603_v34 = vld [vmem:[#allocation5 + $0x66c] ss:$16 sps:$4 sm:$0xff]  }
  0xba   :  { %1721 = vmatprep.subr.bf16.mxu0 %v2516_v35  ;;  %1893 = vmatprep.subr.bf16.mxu1 %v2519_v36  ;;  %v2598_v35 = vld [vmem:[#allocation5 + $0x660] ss:$16 sps:$4 sm:$0xff]   ;;  %v2601_v36 = vld [vmem:[#allocation5 + $0x668] ss:$16 sps:$4 sm:$0xff]  }
  0xbd   :  { %1722 = vmatpush1.bf16.msra.mxu0 %v2514_v37  ;;  %1894 = vmatpush1.bf16.msra.mxu1 %v2517_v38  ;;  %v2606_v37 = vld [vmem:[#allocation5 + $0x684] ss:$16 sps:$4 sm:$0xff]   ;;  %v2609_v38 = vld [vmem:[#allocation5 + $0x68c] ss:$16 sps:$4 sm:$0xff]  }
  0xbe   :  { %1723 = vmatprep.subr.bf16.mxu0 %v2522_v39  ;;  %1895 = vmatprep.subr.bf16.mxu1 %v2525_v40  ;;  %v2604_v39 = vld [vmem:[#allocation5 + $0x680] ss:$16 sps:$4 sm:$0xff]   ;;  %v2607_v40 = vld [vmem:[#allocation5 + $0x688] ss:$16 sps:$4 sm:$0xff]  }
  0xc1   :  { %1724 = vmatpush1.bf16.msra.mxu0 %v2520_v41  ;;  %1896 = vmatpush1.bf16.msra.mxu1 %v2523_v42  ;;  %v2612_v41 = vld [vmem:[#allocation5 + $0x6a4] ss:$16 sps:$4 sm:$0xff]   ;;  %v2615_v42 = vld [vmem:[#allocation5 + $0x6ac] ss:$16 sps:$4 sm:$0xff]  }
  0xc2   :  { %1725 = vmatprep.subr.bf16.mxu0 %v2528_v43  ;;  %1897 = vmatprep.subr.bf16.mxu1 %v2531_v44  ;;  %v2610_v43 = vld [vmem:[#allocation5 + $0x6a0] ss:$16 sps:$4 sm:$0xff]   ;;  %v2613_v44 = vld [vmem:[#allocation5 + $0x6a8] ss:$16 sps:$4 sm:$0xff]  }
  0xc5   :  { %1726 = vmatpush1.bf16.msra.mxu0 %v2526_v45  ;;  %1898 = vmatpush1.bf16.msra.mxu1 %v2529_v46  ;;  %v2618_v45 = vld [vmem:[#allocation5 + $0x6c4] ss:$16 sps:$4 sm:$0xff]   ;;  %v2621_v46 = vld [vmem:[#allocation5 + $0x6cc] ss:$16 sps:$4 sm:$0xff]  }
  0xc6   :  { %1727 = vmatprep.subr.bf16.mxu0 %v2534_v47  ;;  %1899 = vmatprep.subr.bf16.mxu1 %v2537_v48  ;;  %v2616_v47 = vld [vmem:[#allocation5 + $0x6c0] ss:$16 sps:$4 sm:$0xff]   ;;  %v2619_v48 = vld [vmem:[#allocation5 + $0x6c8] ss:$16 sps:$4 sm:$0xff]  }
  0xc9   :  { %1728 = vmatpush1.bf16.msra.mxu0 %v2532_v49  ;;  %1900 = vmatpush1.bf16.msra.mxu1 %v2535_v50  ;;  %v2624_v49 = vld [vmem:[#allocation5 + $0x6e4] ss:$16 sps:$4 sm:$0xff]   ;;  %v2627_v50 = vld [vmem:[#allocation5 + $0x6ec] ss:$16 sps:$4 sm:$0xff]  }
  0xca   :  { %1729 = vmatprep.subr.bf16.mxu0 %v2540_v51  ;;  %1901 = vmatprep.subr.bf16.mxu1 %v2543_v52  ;;  %v2622_v51 = vld [vmem:[#allocation5 + $0x6e0] ss:$16 sps:$4 sm:$0xff]   ;;  %v2625_v52 = vld [vmem:[#allocation5 + $0x6e8] ss:$16 sps:$4 sm:$0xff]  }
  0xcd   :  { %1730 = vmatpush1.bf16.msra.mxu0 %v2538_v53  ;;  %1902 = vmatpush1.bf16.msra.mxu1 %v2541_v54  ;;  %v2630_v53 = vld [vmem:[#allocation5 + $0x704] ss:$16 sps:$4 sm:$0xff]   ;;  %v2633_v54 = vld [vmem:[#allocation5 + $0x70c] ss:$16 sps:$4 sm:$0xff]  }
  0xce   :  { %1731 = vmatprep.subr.bf16.mxu0 %v2546_v55  ;;  %1903 = vmatprep.subr.bf16.mxu1 %v2549_v56  ;;  %v2628_v55 = vld [vmem:[#allocation5 + $0x700] ss:$16 sps:$4 sm:$0xff]   ;;  %v2631_v56 = vld [vmem:[#allocation5 + $0x708] ss:$16 sps:$4 sm:$0xff]  }
  0xd1   :  { %1732 = vmatpush1.bf16.msra.mxu0 %v2544_v57  ;;  %1904 = vmatpush1.bf16.msra.mxu1 %v2547_v58  ;;  %v2636_v57 = vld [vmem:[#allocation5 + $0x724] ss:$16 sps:$4 sm:$0xff]   ;;  %v2639_v58 = vld [vmem:[#allocation5 + $0x72c] ss:$16 sps:$4 sm:$0xff]  }
  0xd2   :  { %1733 = vmatprep.subr.bf16.mxu0 %v2552_v59  ;;  %1905 = vmatprep.subr.bf16.mxu1 %v2555_v60  ;;  %v2634_v59 = vld [vmem:[#allocation5 + $0x720] ss:$16 sps:$4 sm:$0xff]   ;;  %v2637_v60 = vld [vmem:[#allocation5 + $0x728] ss:$16 sps:$4 sm:$0xff]  }
  0xd5   :  { %1734 = vmatpush1.bf16.msra.mxu0 %v2550_v61  ;;  %1906 = vmatpush1.bf16.msra.mxu1 %v2553_v62  ;;  %v2642_v61 = vld [vmem:[#allocation5 + $0x744] ss:$16 sps:$4 sm:$0xff]   ;;  %v2645_v62 = vld [vmem:[#allocation5 + $0x74c] ss:$16 sps:$4 sm:$0xff]  }
  0xd6   :  { %1735 = vmatprep.subr.bf16.mxu0 %v2558_v63  ;;  %1907 = vmatprep.subr.bf16.mxu1 %v2561_v0  ;;  %v2640_v63 = vld [vmem:[#allocation5 + $0x740] ss:$16 sps:$4 sm:$0xff]   ;;  %v2643_v0 = vld [vmem:[#allocation5 + $0x748] ss:$16 sps:$4 sm:$0xff]  }
  0xd9   :  { %1736 = vmatpush1.bf16.msra.mxu0 %v2556_v1  ;;  %1908 = vmatpush1.bf16.msra.mxu1 %v2559_v2  ;;  %v2648_v1 = vld [vmem:[#allocation5 + $0x764] ss:$16 sps:$4 sm:$0xff]   ;;  %v2651_v2 = vld [vmem:[#allocation5 + $0x76c] ss:$16 sps:$4 sm:$0xff]  }
  0xda   :  { %1737 = vmatprep.subr.bf16.mxu0 %v2564_v3  ;;  %1909 = vmatprep.subr.bf16.mxu1 %v2567_v4  ;;  %v2646_v3 = vld [vmem:[#allocation5 + $0x760] ss:$16 sps:$4 sm:$0xff]   ;;  %v2649_v4 = vld [vmem:[#allocation5 + $0x768] ss:$16 sps:$4 sm:$0xff]  }
  0xdd   :  { %1738 = vmatpush1.bf16.msra.mxu0 %v2562_v5  ;;  %1910 = vmatpush1.bf16.msra.mxu1 %v2565_v6  ;;  %v2654_v5 = vld [vmem:[#allocation5 + $0x784] ss:$16 sps:$4 sm:$0xff]   ;;  %v2657_v6 = vld [vmem:[#allocation5 + $0x78c] ss:$16 sps:$4 sm:$0xff]  }
  0xde   :  { %1739 = vmatprep.subr.bf16.mxu0 %v2570_v7  ;;  %1911 = vmatprep.subr.bf16.mxu1 %v2573_v8  ;;  %v2652_v7 = vld [vmem:[#allocation5 + $0x780] ss:$16 sps:$4 sm:$0xff]   ;;  %v2655_v8 = vld [vmem:[#allocation5 + $0x788] ss:$16 sps:$4 sm:$0xff]  }
  0xe1   :  { %1740 = vmatpush1.bf16.msra.mxu0 %v2568_v9  ;;  %1912 = vmatpush1.bf16.msra.mxu1 %v2571_v10  ;;  %v2660_v9 = vld [vmem:[#allocation5 + $0x7a4] ss:$16 sps:$4 sm:$0xff]   ;;  %v2663_v10 = vld [vmem:[#allocation5 + $0x7ac] ss:$16 sps:$4 sm:$0xff]  }
  0xe2   :  { %1741 = vmatprep.subr.bf16.mxu0 %v2576_v11  ;;  %1913 = vmatprep.subr.bf16.mxu1 %v2579_v12  ;;  %v2658_v11 = vld [vmem:[#allocation5 + $0x7a0] ss:$16 sps:$4 sm:$0xff]   ;;  %v2661_v12 = vld [vmem:[#allocation5 + $0x7a8] ss:$16 sps:$4 sm:$0xff]  }
  0xe5   :  { %1742 = vmatpush1.bf16.msra.mxu0 %v2574_v13  ;;  %1914 = vmatpush1.bf16.msra.mxu1 %v2577_v14  ;;  %v2666_v13 = vld [vmem:[#allocation5 + $0x7c4] ss:$16 sps:$4 sm:$0xff]   ;;  %v2669_v14 = vld [vmem:[#allocation5 + $0x7cc] ss:$16 sps:$4 sm:$0xff]  }
  0xe6   :  { %1754 = vmatprep.subr.bf16.mxu0 %v2582_v17  ;;  %1926 = vmatprep.subr.bf16.mxu1 %v2585_v18  ;;  %v2672_v17 = vld [vmem:[#allocation5 + $0x7e4] ss:$16 sps:$4 sm:$0xff]   ;;  %v2675_v18 = vld [vmem:[#allocation5 + $0x7ec] ss:$16 sps:$4 sm:$0xff]  }
  0xe8   :  { %1744 = vmatmul.mubr.bf16.vlgmr.msra.gmra.mrb[0].mxu0 %v63_v19  ;;  %1916 = vmatmul.mubr.bf16.vlgmr.msra.gmra.mrb[0].mxu1 %v63_v19  ;;  %v2670_v19 = vld [vmem:[#allocation5 + $0x7e0] ss:$16 sps:$4 sm:$0xff]  }
  0xe9   :  { %1755 = vmatpush1.bf16.msra.mxu0 %v2580_v22  ;;  %1927 = vmatpush1.bf16.msra.mxu1 %v2583_v23  ;;  %v57_v22 = vld [vmem:[#allocation2 + $0x70] sm:$0xff] }
  0xea   :  { %1756 = vmatprep.subr.bf16.mxu0 %v2588_v24  ;;  %1928 = vmatprep.subr.bf16.mxu1 %v2591_v25  ;;  %v65_v23 = vpack.c.bf16 %v57_v22, %v49_v21  ;;  %v325_v24 = vlaneseq }
  0xeb   :  { %1786 = vmatprep.mubr.bf16.mxu0 %v66_v26  ;;  %1958 = vmatprep.mubr.bf16.mxu1 %v66_v26 }
  0xec   :  { %v326_v25 = vshrl.u32 %v325_v24, 7 }
  0xed   :  { %1757 = vmatpush1.bf16.msra.mxu0 %v2586_v27  ;;  %1929 = vmatpush1.bf16.msra.mxu1 %v2589_v28  ;;  %v323_v28 = vld [vmem:[%s2818_s2] sm:$0xf]  ;;  %s2720_s2 = scalar_lea.vmem %s1983_s14, 1024 }
  0xee   :  { %1758 = vmatprep.subr.bf16.mxu0 %v2594_v29  ;;  %1930 = vmatprep.subr.bf16.mxu1 %v2597_v30  ;;  %v327_v26 = vsub.s32 0, %v326_v25  ;;  %v335_v27 = vsub.s32 2, %v326_v25  ;;  %v331_v29 = vsub.s32 1, %v326_v25  ;;  %v339_v30 = vsub.s32 3, %v326_v25  ;;  %p2721_p2 = scmp.ne.s32.totalorder %s1983_s14, %s2720_s2  ;;  %p2726_p4 = scmp.lt.s32.totalorder %s2720_s2, %s2720_s2 }
  0xf0   :  { %p2727_p5 = por %p2726_p4, %p2725_p3 }
  0xf1   :  { %1759 = vmatpush1.bf16.msra.mxu0 %v2592_v31  ;;  %1931 = vmatpush1.bf16.msra.mxu1 %v2595_v32  ;;  %v328_v31 = vrot.slane %v323_v28, %v327_v26  ;;  %v336_v32 = vrot.slane %v323_v28, %v335_v27 }
  0xf2   :  { %1760 = vmatprep.subr.bf16.mxu0 %v2600_v33  ;;  %1932 = vmatprep.subr.bf16.mxu1 %v2603_v34  ;;  %v332_v33 = vrot.slane %v323_v28, %v331_v29  ;;  %v340_v34 = vrot.slane %v323_v28, %v339_v30  ;;  %p2728_p6 = pnand %p2727_p5, %p2721_p2 }
  0xf5   :  { %1761 = vmatpush1.bf16.msra.mxu0 %v2598_v35  ;;  %1933 = vmatpush1.bf16.msra.mxu1 %v2601_v36 }
  0xf6   :  { %1762 = vmatprep.subr.bf16.mxu0 %v2606_v37  ;;  %1934 = vmatprep.subr.bf16.mxu1 %v2609_v38 }
  0xf9   :  { %1763 = vmatpush1.bf16.msra.mxu0 %v2604_v39  ;;  %1935 = vmatpush1.bf16.msra.mxu1 %v2607_v40 }
  0xfa   :  { %1764 = vmatprep.subr.bf16.mxu0 %v2612_v41  ;;  %1936 = vmatprep.subr.bf16.mxu1 %v2615_v42 }
  0xfd   :  { %1765 = vmatpush1.bf16.msra.mxu0 %v2610_v43  ;;  %1937 = vmatpush1.bf16.msra.mxu1 %v2613_v44 }
  0xfe   :  { %1766 = vmatprep.subr.bf16.mxu0 %v2618_v45  ;;  %1938 = vmatprep.subr.bf16.mxu1 %v2621_v46 }
 0x101   :  { %1767 = vmatpush1.bf16.msra.mxu0 %v2616_v47  ;;  %1939 = vmatpush1.bf16.msra.mxu1 %v2619_v48 }
 0x102   :  { %1768 = vmatprep.subr.bf16.mxu0 %v2624_v49  ;;  %1940 = vmatprep.subr.bf16.mxu1 %v2627_v50 }
 0x105   :  { %1769 = vmatpush1.bf16.msra.mxu0 %v2622_v51  ;;  %1941 = vmatpush1.bf16.msra.mxu1 %v2625_v52 }
 0x106   :  { %1770 = vmatprep.subr.bf16.mxu0 %v2630_v53  ;;  %1942 = vmatprep.subr.bf16.mxu1 %v2633_v54 }
 0x109   :  { %1771 = vmatpush1.bf16.msra.mxu0 %v2628_v55  ;;  %1943 = vmatpush1.bf16.msra.mxu1 %v2631_v56 }
 0x10a   :  { %1772 = vmatprep.subr.bf16.mxu0 %v2636_v57  ;;  %1944 = vmatprep.subr.bf16.mxu1 %v2639_v58 }
 0x10d   :  { %1773 = vmatpush1.bf16.msra.mxu0 %v2634_v59  ;;  %1945 = vmatpush1.bf16.msra.mxu1 %v2637_v60 }
 0x10e   :  { %1774 = vmatprep.subr.bf16.mxu0 %v2642_v61  ;;  %1946 = vmatprep.subr.bf16.mxu1 %v2645_v62 }
 0x111   :  { %1775 = vmatpush1.bf16.msra.mxu0 %v2640_v63  ;;  %1947 = vmatpush1.bf16.msra.mxu1 %v2643_v0 }
 0x112   :  { %1776 = vmatprep.subr.bf16.mxu0 %v2648_v1  ;;  %1948 = vmatprep.subr.bf16.mxu1 %v2651_v2 }
 0x115   :  { %1777 = vmatpush1.bf16.msra.mxu0 %v2646_v3  ;;  %1949 = vmatpush1.bf16.msra.mxu1 %v2649_v4 }
 0x116   :  { %1778 = vmatprep.subr.bf16.mxu0 %v2654_v5  ;;  %1950 = vmatprep.subr.bf16.mxu1 %v2657_v6 }
 0x119   :  { %1779 = vmatpush1.bf16.msra.mxu0 %v2652_v7  ;;  %1951 = vmatpush1.bf16.msra.mxu1 %v2655_v8 }
 0x11a   :  { %1780 = vmatprep.subr.bf16.mxu0 %v2660_v9  ;;  %1952 = vmatprep.subr.bf16.mxu1 %v2663_v10 }
 0x11d   :  { %1781 = vmatpush1.bf16.msra.mxu0 %v2658_v11  ;;  %1953 = vmatpush1.bf16.msra.mxu1 %v2661_v12 }
 0x11e   :  { %1782 = vmatprep.subr.bf16.mxu0 %v2666_v13  ;;  %1954 = vmatprep.subr.bf16.mxu1 %v2669_v14 }
 0x121   :  { %1783 = vmatpush1.bf16.msra.mxu0 %v2664_v15  ;;  %1955 = vmatpush1.bf16.msra.mxu1 %v2667_v16 }
 0x122   :  { %1784 = vmatprep.subr.bf16.mxu0 %v2672_v17  ;;  %1956 = vmatprep.subr.bf16.mxu1 %v2675_v18 }
 0x125   :  { %1785 = vmatpush1.bf16.msra.mxu0 %v2670_v19  ;;  %1957 = vmatpush1.bf16.msra.mxu1 %v2673_v20 }
 0x128   :  { %1787 = vmatmul.mubr.bf16.vlgmr.msra.gmra.mrb[0].mxu0 %v65_v23  ;;  %1959 = vmatmul.mubr.bf16.vlgmr.msra.gmra.mrb[0].mxu1 %v65_v23 }
 0x1fb   :  { %v1788_v35 = vpop.f32.mrb[0].mxu0  ;;  %v1960_v36 = vpop.f32.mrb[0].mxu1 }
 0x1fc   :  { %v2251_v37 = vadd.f32 %v1788_v35, %v328_v31  ;;  %v2255_v38 = vadd.f32 %v1960_v36, %v336_v32  ;;  %v1790_v39 = vpop.f32.mrb[1].mxu0  ;;  %v1962_v40 = vpop.f32.mrb[1].mxu1 }
 0x1fd   :  { %v2252_v41 = vadd.f32 %v1790_v39, %v332_v33  ;;  %v2256_v42 = vadd.f32 %v1962_v40, %v340_v34  ;;  %v1792_v43 = vpop.f32.mrb[2].mxu0  ;;  %v1964_v44 = vpop.f32.mrb[2].mxu1 }
 0x1fe   :  { %1969 = vst [vmem:[#allocation7] sm:$0xff] %v2251_v37  ;;  %1971 = vst [vmem:[#allocation7 + $0x10] sm:$0xff] %v2255_v38  ;;  %v2253_v45 = vadd.f32 %v1792_v43, %v328_v31  ;;  %v2257_v46 = vadd.f32 %v1964_v44, %v336_v32  ;;  %v1794_v47 = vpop.f32.mrb[3].mxu0  ;;  %v1966_v48 = vpop.f32.mrb[3].mxu1 }
 0x1ff   :  { %1970 = vst [vmem:[#allocation7 + $0x8] sm:$0xff] %v2252_v41  ;;  %1972 = vst [vmem:[#allocation7 + $0x18] sm:$0xff] %v2256_v42  ;;  %v2254_v49 = vadd.f32 %v1794_v47, %v332_v33  ;;  %v2258_v50 = vadd.f32 %v1966_v48, %v340_v34 }
 0x200   :  { %1973 = vst [vmem:[#allocation7 + $0x20] sm:$0xff] %v2253_v45  ;;  %1975 = vst [vmem:[#allocation7 + $0x30] sm:$0xff] %v2257_v46 }
 0x201   :  { %1974 = vst [vmem:[#allocation7 + $0x28] sm:$0xff] %v2254_v49  ;;  %1976 = vst [vmem:[#allocation7 + $0x38] sm:$0xff] %v2258_v50 }
 0x202   :  { %2731 = shalt.err (!%p2728_p6)
}
 0x203   :  { %s2732_s17 = scalar_lea.hbm %s2819_s3, 1024 }
 0x204   :  { %p2733_p7 = scmp.ne.s32.totalorder %s2819_s3, %s2732_s17  ;;  %p2736_p8 = scmp.lt.u32.totalorder %s2732_s17, %s2819_s3 }
 0x206   :  { %p2738_p9 = pnand %p2736_p8, %p2733_p7 }
 0x208   :  { %2741 = shalt.err (!%p2738_p9)
}
 0x209   :  { %s2755_s22 = smov 512   ;;  %s2756_s23 = smov 32  }
 0x20a   :  { %1988 = dma.vmem_to_hbm [thread:$0]  %s1983_s14, 1024, %s2819_s3, [#allocation4], %s2755_s22, %s2755_s22, %s2756_s23  }
 0x20b   :  { %2746 = dma.done.wait [#allocation4], 1024  }
 0x20c   :  { %2747 = vsyncadd [#allocation4], 4294966272 }
 0x20d   :  { %1992 = vsyncpa [#allocation3], 1 }
 0x20e   :  { %1993 = vsyncpa [#allocation6], 1 }
 0x20f   :  { %1994 = vsyncpa [#allocation4], 1 }

</bundles_post_ra>
